<compile_context>
chip_gen: v7x
topology: tpu7x:2x2x1
jax: 0.10.0
libtpu: 0.0.40
codegen_flags: <defaults>
</compile_context>

<pallas_src>
import functools

import jax
import jax.numpy as jnp
from jax.experimental import pallas as pl
from jax.experimental.pallas import tpu as pltpu

LEAKY_SLOPE = 0.01  # torch.nn.functional.leaky_relu default negative_slope


def _round_up(n: int, m: int) -> int:
    return ((n + m - 1) // m) * m


def _make_mlp_kernel(num_layers: int):
    """Fused feature-major MLP kernel.

    Ref order: (x_ref, W_0, b_0, ..., W_{L-1}, b_{L-1}, o_ref)
      x_ref : (in_0,  TILE_B)  activations, batch on the lane axis
      W_i   : (out_i, in_i)    PyTorch nn.Linear layout, VMEM-resident
      b_i   : (out_i, 1)       broadcasts over the lane (batch) axis
      o_ref : (out_L, TILE_B)
    Leaky ReLU after every layer except the last (matches HeartsNN.forward).
    """

    def kernel(*refs):
        x_ref = refs[0]
        o_ref = refs[-1]
        param_refs = refs[1:-1]

        h = x_ref[...]                                    # (in_0, TILE_B) f32
        for i in range(num_layers):
            w = param_refs[2 * i][...]                    # (out_i, in_i)
            b = param_refs[2 * i + 1][...]                # (out_i, 1)
            h = jnp.dot(w, h, preferred_element_type=jnp.float32) + b
            if i < num_layers - 1:
                h = jnp.where(h > 0, h, LEAKY_SLOPE * h)
        o_ref[...] = h.astype(o_ref.dtype)

    return kernel


@functools.partial(jax.jit, static_argnames=("tile_b",))
def hearts_nn_forward(x, params, *, tile_b=None):
    """HeartsNN forward.

    x:      (batch, observation_space) float32
    params: list of (W, b); W is (out, in) [PyTorch nn.Linear layout], b is (out,)
    """
    batch, obs = x.shape
    action = params[-1][0].shape[0]
    num_layers = len(params)

    # Batch tile: multiple of 128 so batch is dense on the lane axis.
    if tile_b is None:
        tile_b = min(512, _round_up(max(batch, 1), 128))
    b_padded = _round_up(batch, tile_b)
    grid = (b_padded // tile_b,)

    # Feature-major layout plumbing: pad the batch tail with zeros, transpose.
    x_t = jnp.pad(x, ((0, b_padded - batch), (0, 0))).T       # (obs, b_padded)

    flat_params = []
    in_specs = [pl.BlockSpec((obs, tile_b), lambda i: (0, i))]
    for w, b in params:
        out_f, in_f = w.shape
        flat_params.append(w)
        flat_params.append(b.reshape(out_f, 1))
        # Constant index_map -> weights/bias fetched once, stay resident.
        in_specs.append(pl.BlockSpec((out_f, in_f), lambda i: (0, 0)))
        in_specs.append(pl.BlockSpec((out_f, 1), lambda i: (0, 0)))

    out_spec = pl.BlockSpec((action, tile_b), lambda i: (0, i))

    # Advisory cost estimate so XLA can schedule surrounding ops sensibly.
    flops = 2 * b_padded * sum(int(w.shape[0]) * int(w.shape[1]) for w, _ in params)
    bytes_accessed = 4 * (
        b_padded * (obs + action)
        + sum(int(w.size) + int(w.shape[0]) for w, _ in params)
    )
    cost = pl.CostEstimate(
        flops=flops, transcendentals=0, bytes_accessed=bytes_accessed
    )

    out_t = pl.pallas_call(
        _make_mlp_kernel(num_layers),
        out_shape=jax.ShapeDtypeStruct((action, b_padded), jnp.float32),
        grid=grid,
        in_specs=in_specs,
        out_specs=out_spec,
        compiler_params=pltpu.CompilerParams(
            dimension_semantics=("parallel",)
        ),
        cost_estimate=cost,
    )(x_t, *flat_params)

    return out_t.T[:batch]


def init_hearts_nn_params(key, observation_space, action_space, hidden_shape):
    """Deterministic synthetic parameters mirroring HeartsNN.__init__ shapes.

    Returns a list of (W, b) with W in PyTorch's (out, in) layout and b (out,).
    Layer dims: inputLayer, hidden_0 .. hidden_{k-2}, outputLayer.
    """
    dims = [observation_space, hidden_shape[0]]
    for i in range(len(hidden_shape) - 1):
        dims.append(hidden_shape[i + 1])
    dims.append(action_space)

    params = []
    for i in range(len(dims) - 1):
        fan_in, fan_out = dims[i], dims[i + 1]
        key, wk, bk = jax.random.split(key, 3)
        bound = 1.0 / jnp.sqrt(jnp.float32(fan_in))
        w = jax.random.uniform(wk, (fan_out, fan_in), jnp.float32, -bound, bound)
        b = jax.random.uniform(bk, (fan_out,), jnp.float32, -bound, bound)
        params.append((w, b))
    return params


def reference_forward(x, params):
    """Pure-JAX reference of HeartsNN.forward (batch-major, PyTorch layout)."""
    h = x
    n = len(params)
    for i, (w, b) in enumerate(params):
        h = h @ w.T + b
        if i < n - 1:
            h = jnp.where(h > 0, h, LEAKY_SLOPE * h)
    return h


if __name__ == "__main__":
    observation_space = 16
    action_space = 8
    hidden_shape = [32, 32]   # inputLayer(16->32), hidden_0(32->32), outputLayer(32->8)

    key = jax.random.PRNGKey(0)
    key, pkey = jax.random.split(key)
    params = init_hearts_nn_params(pkey, observation_space, action_space, hidden_shape)

    # (batch, tile_b): small toy batch + a ragged multi-tile batch to exercise
    # the grid / tail-padding path.
    for batch, tile_b in [(2, None), (300, 128)]:
        key, xk = jax.random.split(key)
        x = jax.random.normal(xk, (batch, observation_space), jnp.float32)

        out = hearts_nn_forward(x, params, tile_b=tile_b)
        out = jax.block_until_ready(out)

        ref = reference_forward(x, params)
        assert out.shape == (batch, action_space), out.shape
        assert jnp.allclose(out, ref, atol=1e-5, rtol=1e-5), "mismatch vs reference"

    print("KERNEL_OK")
</pallas_src>

<mosaic_0001>
module attributes {stable_mosaic.version = 11 : i64} {
  func.func @kernel(%arg0: i32, %arg1: memref<16x128xf32, #tpu.memory_space<vmem>>, %arg2: memref<32x16xf32, #tpu.memory_space<vmem>>, %arg3: memref<32x1xf32, #tpu.memory_space<vmem>>, %arg4: memref<32x32xf32, #tpu.memory_space<vmem>>, %arg5: memref<32x1xf32, #tpu.memory_space<vmem>>, %arg6: memref<8x32xf32, #tpu.memory_space<vmem>>, %arg7: memref<8x1xf32, #tpu.memory_space<vmem>>, %arg8: memref<8x128xf32, #tpu.memory_space<vmem>>) attributes {dimension_semantics = [#tpu.dimension_semantics<parallel>], iteration_bounds = array<i64: 1>, scalar_prefetch = 0 : i64, scratch_operands = 0 : i64, tpu.core_type = #tpu.core_type<tc>, window_params = [{transform_indices = @transform_0, window_bounds = array<i64: 16, 128>}, {pipeline_mode = #tpu.pipeline_mode<synchronous>, transform_indices = @transform_1, window_bounds = array<i64: 32, 16>}, {pipeline_mode = #tpu.pipeline_mode<synchronous>, transform_indices = @transform_2, window_bounds = array<i64: 32, 1>}, {pipeline_mode = #tpu.pipeline_mode<synchronous>, transform_indices = @transform_3, window_bounds = array<i64: 32, 32>}, {pipeline_mode = #tpu.pipeline_mode<synchronous>, transform_indices = @transform_4, window_bounds = array<i64: 32, 1>}, {pipeline_mode = #tpu.pipeline_mode<synchronous>, transform_indices = @transform_5, window_bounds = array<i64: 8, 32>}, {pipeline_mode = #tpu.pipeline_mode<synchronous>, transform_indices = @transform_6, window_bounds = array<i64: 8, 1>}, {transform_indices = @transform_7, window_bounds = array<i64: 8, 128>}]} {
    %c0 = arith.constant 0 : index
    %c0_0 = arith.constant 0 : index
    %0 = vector.load %arg1[%c0, %c0_0] : memref<16x128xf32, #tpu.memory_space<vmem>>, vector<16x128xf32>
    %c0_1 = arith.constant 0 : index
    %c0_2 = arith.constant 0 : index
    %1 = vector.load %arg2[%c0_1, %c0_2] : memref<32x16xf32, #tpu.memory_space<vmem>>, vector<32x16xf32>
    %c0_3 = arith.constant 0 : index
    %c0_4 = arith.constant 0 : index
    %2 = vector.load %arg3[%c0_3, %c0_4] : memref<32x1xf32, #tpu.memory_space<vmem>>, vector<32x1xf32>
    %cst = arith.constant dense<0.000000e+00> : vector<32x128xf32>
    %3 = tpu.matmul %1, %0, %cst {dimension_numbers = #tpu.dot_dimension_numbers<[1], [0], [0], [1], [0, 0, 1, 1], [], []>} : vector<32x16xf32>, vector<16x128xf32>, vector<32x128xf32> -> vector<32x128xf32>
    %4 = vector.broadcast %2 : vector<32x1xf32> to vector<32x128xf32>
    %5 = arith.addf %3, %4 : vector<32x128xf32>
    %cst_5 = arith.constant 0.000000e+00 : f32
    %6 = vector.broadcast %cst_5 : f32 to vector<32x128xf32>
    %7 = arith.cmpf ogt, %5, %6 : vector<32x128xf32>
    %cst_6 = arith.constant 0.00999999977 : f32
    %8 = vector.broadcast %cst_6 : f32 to vector<32x128xf32>
    %9 = arith.mulf %8, %5 : vector<32x128xf32>
    %10 = arith.select %7, %5, %9 : vector<32x128xi1>, vector<32x128xf32>
    %c0_7 = arith.constant 0 : index
    %c0_8 = arith.constant 0 : index
    %11 = vector.load %arg4[%c0_7, %c0_8] : memref<32x32xf32, #tpu.memory_space<vmem>>, vector<32x32xf32>
    %c0_9 = arith.constant 0 : index
    %c0_10 = arith.constant 0 : index
    %12 = vector.load %arg5[%c0_9, %c0_10] : memref<32x1xf32, #tpu.memory_space<vmem>>, vector<32x1xf32>
    %cst_11 = arith.constant dense<0.000000e+00> : vector<32x128xf32>
    %13 = tpu.matmul %11, %10, %cst_11 {dimension_numbers = #tpu.dot_dimension_numbers<[1], [0], [0], [1], [0, 0, 1, 1], [], []>} : vector<32x32xf32>, vector<32x128xf32>, vector<32x128xf32> -> vector<32x128xf32>
    %14 = vector.broadcast %12 : vector<32x1xf32> to vector<32x128xf32>
    %15 = arith.addf %13, %14 : vector<32x128xf32>
    %cst_12 = arith.constant 0.000000e+00 : f32
    %16 = vector.broadcast %cst_12 : f32 to vector<32x128xf32>
    %17 = arith.cmpf ogt, %15, %16 : vector<32x128xf32>
    %cst_13 = arith.constant 0.00999999977 : f32
    %18 = vector.broadcast %cst_13 : f32 to vector<32x128xf32>
    %19 = arith.mulf %18, %15 : vector<32x128xf32>
    %20 = arith.select %17, %15, %19 : vector<32x128xi1>, vector<32x128xf32>
    %c0_14 = arith.constant 0 : index
    %c0_15 = arith.constant 0 : index
    %21 = vector.load %arg6[%c0_14, %c0_15] : memref<8x32xf32, #tpu.memory_space<vmem>>, vector<8x32xf32>
    %c0_16 = arith.constant 0 : index
    %c0_17 = arith.constant 0 : index
    %22 = vector.load %arg7[%c0_16, %c0_17] : memref<8x1xf32, #tpu.memory_space<vmem>>, vector<8x1xf32>
    %cst_18 = arith.constant dense<0.000000e+00> : vector<8x128xf32>
    %23 = tpu.matmul %21, %20, %cst_18 {dimension_numbers = #tpu.dot_dimension_numbers<[1], [0], [0], [1], [0, 0, 1, 1], [], []>} : vector<8x32xf32>, vector<32x128xf32>, vector<8x128xf32> -> vector<8x128xf32>
    %24 = vector.broadcast %22 : vector<8x1xf32> to vector<8x128xf32>
    %25 = arith.addf %23, %24 : vector<8x128xf32>
    %c0_19 = arith.constant 0 : index
    %c0_20 = arith.constant 0 : index
    %26 = vector.load %arg8[%c0_19, %c0_20] : memref<8x128xf32, #tpu.memory_space<vmem>>, vector<8x128xf32>
    tpu.vector_store %arg8[%c0_19, %c0_20], %25 {strides = array<i32>} : memref<8x128xf32, #tpu.memory_space<vmem>>, vector<8x128xf32>,
    return
  }
  func.func @transform_0(%arg0: i32) -> (i32, i32) {
    %c0_i32 = arith.constant 0 : i32
    %c0_i32_0 = arith.constant 0 : i32
    return %c0_i32, %arg0 : i32, i32
  }
  func.func @transform_1(%arg0: i32) -> (i32, i32) {
    %c0_i32 = arith.constant 0 : i32
    %c0_i32_0 = arith.constant 0 : i32
    %c0_i32_1 = arith.constant 0 : i32
    return %c0_i32, %c0_i32_0 : i32, i32
  }
  func.func @transform_2(%arg0: i32) -> (i32, i32) {
    %c0_i32 = arith.constant 0 : i32
    %c0_i32_0 = arith.constant 0 : i32
    %c0_i32_1 = arith.constant 0 : i32
    return %c0_i32, %c0_i32_0 : i32, i32
  }
  func.func @transform_3(%arg0: i32) -> (i32, i32) {
    %c0_i32 = arith.constant 0 : i32
    %c0_i32_0 = arith.constant 0 : i32
    %c0_i32_1 = arith.constant 0 : i32
    return %c0_i32, %c0_i32_0 : i32, i32
  }
  func.func @transform_4(%arg0: i32) -> (i32, i32) {
    %c0_i32 = arith.constant 0 : i32
    %c0_i32_0 = arith.constant 0 : i32
    %c0_i32_1 = arith.constant 0 : i32
    return %c0_i32, %c0_i32_0 : i32, i32
  }
  func.func @transform_5(%arg0: i32) -> (i32, i32) {
    %c0_i32 = arith.constant 0 : i32
    %c0_i32_0 = arith.constant 0 : i32
    %c0_i32_1 = arith.constant 0 : i32
    return %c0_i32, %c0_i32_0 : i32, i32
  }
  func.func @transform_6(%arg0: i32) -> (i32, i32) {
    %c0_i32 = arith.constant 0 : i32
    %c0_i32_0 = arith.constant 0 : i32
    %c0_i32_1 = arith.constant 0 : i32
    return %c0_i32, %c0_i32_0 : i32, i32
  }
  func.func @transform_7(%arg0: i32) -> (i32, i32) {
    %c0_i32 = arith.constant 0 : i32
    %c0_i32_0 = arith.constant 0 : i32
    return %c0_i32, %arg0 : i32, i32
  }
}

</mosaic_0001>

<bundles_post_ra>
// kernel: hearts_nn_forward.1
= control target key start
LH: loop header
LB: loop body
LE: loop exit
PB: predicated region body
PF: predicated region fallthrough
CT: control target
= control target key end

     0   :  { %vm56_vm0 = vcmask 130048   ;;  %v476_v3 = vmov 0   ;;  %vm194_vm1 = vcmask 261120   ;;  %v477_v43 = vmov 0.0|0.0   ;;  %s592_s0 = inlined_call_operand.vmem [shape: f32[16,128], index: 0, kind: input, shape index: {}]   ;;  %s593_s1 = inlined_call_operand.vmem [shape: f32[32,16], index: 1, kind: input, shape index: {}]   ;;  %s594_s2 = inlined_call_operand.vmem [shape: f32[32,1], index: 2, kind: input, shape index: {}]   ;;  %s595_s4 = inlined_call_operand.vmem [shape: f32[32,1], index: 4, kind: input, shape index: {}]   ;;  %s596_s6 = inlined_call_operand.vmem [shape: f32[8,1], index: 6, kind: input, shape index: {}]   ;;  %s597_s3 = inlined_call_operand.vmem [shape: f32[32,32], index: 3, kind: input, shape index: {}]   ;;  %s598_s5 = inlined_call_operand.vmem [shape: f32[8,32], index: 5, kind: input, shape index: {}]   ;;  %s599_s7 = inlined_call_operand.vmem [shape: f32[8,128], index: 7, kind: output, shape index: {}]  }
   0x1   :  { %v26_v0 = vld [vmem:[%s592_s0] sm:$0xff]  ;;  %v27_v1 = vld [vmem:[%s592_s0 + $0x8] sm:$0xff]  ;;  %474 = vset.pattern.permute.xlu0 %v476_v3  ;;  %475 = vset.pattern.permute.xlu1 %v476_v3  ;;  %v34_v6 = vld [vmem:[%s594_s2 + $0x10] sm:$0xff]  ;;  %vm478_vm6 = vmmov 0   ;;  %v479_v44 = vmov 0.0  }
   0x2   :  { %v28_v2 = vld [vmem:[%s593_s1] sm:$0xff]  ;;  %v452_v4 = vpack.c.bf16 %v27_v1, %v26_v0  ;;  %v29_v7 = vld [vmem:[%s593_s1 + $0x8] sm:$0xff]  ;;  %48 = vperm.xlu1 %475, %v34_v6   ;;  %v30_v9 = vld [vmem:[%s593_s1 + $0x10] sm:$0xff] }
   0x3   :  { %421 = vmatprep.mubr.msk.f32.mxu0 %vm56_vm0, %v28_v2  ;;  %v32_v5 = vld [vmem:[%s594_s2] sm:$0xff]  ;;  %v33_v8 = vld [vmem:[%s594_s2 + $0x8] sm:$0xff]  ;;  %v35_v10 = vld [vmem:[%s594_s2 + $0x18] sm:$0xff] }
   0x4   :  { %453 = vmatprep.subr.bf16.mxu0 %v452_v4  ;;  %38 = vperm.xlu0 %474, %v32_v5   ;;  %v31_v11 = vld [vmem:[%s593_s1 + $0x18] sm:$0xff]  ;;  %v170_v12 = vld [vmem:[%s595_s4] sm:$0xff]  ;;  %v171_v13 = vld [vmem:[%s595_s4 + $0x8] sm:$0xff] }
   0x5   :  { %455 = vmatpush3.bf16.msra.mxu0 %v452_v4  ;;  %v172_v14 = vld [vmem:[%s595_s4 + $0x10] sm:$0xff]  ;;  %v173_v15 = vld [vmem:[%s595_s4 + $0x18] sm:$0xff]  ;;  %v305_v16 = vld [vmem:[%s596_s6] sm:$0xff] }
   0x6   :  { %53 = vperm.xlu1 %475, %v35_v10   ;;  %v166_v17 = vld [vmem:[%s597_s3] sm:$0xff]  ;;  %v167_v40 = vld [vmem:[%s597_s3 + $0x8] sm:$0xff]  ;;  %v168_v41 = vld [vmem:[%s597_s3 + $0x10] sm:$0xff]  ;;  %464 = vmatprep.subr.bf16.mxu0 %v477_v43 }
   0x7   :  { %435 = vmatprep.mubr.msk.f32.mxu1 %vm194_vm1, %v166_v17  ;;  %v169_v42 = vld [vmem:[%s597_s3 + $0x18] sm:$0xff]  ;;  %v304_v3 = vld [vmem:[%s598_s5] sm:$0xff] }
   0x8   :  { %422 = vmatmul.mubr.msk.f32.vlgmr.msra.gmra.mrb[0].mxu0 %vm56_vm0, %v29_v7  ;;  %43 = vperm.xlu0 %474, %v33_v8  }
   0x9   :  { %424 = vmatprep.mubr.msk.f32.mxu0 %vm56_vm0, %v30_v9 }
   0xa   :  { %181 = vperm.xlu1 %475, %v171_v13  }
   0xc   :  { %425 = vmatmul.mubr.msk.f32.gmra.mrb[2].mxu0 %vm56_vm0, %v31_v11  ;;  %176 = vperm.xlu0 %474, %v170_v12  }
   0xd   :  { %449 = vmatprep.mubr.msk.f32.mxu0 %vm478_vm6, %v479_v44 }
   0xe   :  { %191 = vperm.xlu1 %475, %v173_v15  }
  0x10   :  { %186 = vperm.xlu0 %474, %v172_v14  }
  0x14   :  { %308 = vperm.xlu0 %474, %v305_v16  }
  0x81   :  { %v49_v19 = vpop.permute.xlu1 %48 }
  0x83   :  { %v39_v18 = vpop.permute.xlu0 %38 }
  0x85   :  { %v54_v26 = vpop.permute.xlu1 %53 }
  0x87   :  { %v44_v20 = vpop.permute.xlu0 %43 }
  0x89   :  { %v182_v45 = vpop.permute.xlu1 %181 }
  0x8b   :  { %v177_v46 = vpop.permute.xlu0 %176 }
  0x8d   :  { %v192_v52 = vpop.permute.xlu1 %191 }
  0x8f   :  { %v187_v55 = vpop.permute.xlu0 %186 }
  0x93   :  { %v309_v4 = vpop.permute.xlu0 %308 }
  0xdb   :  { %v423_v21 = vpop.f32.mrb[0].mxu0 }
  0xdc   :  { %v141_v22 = vadd.f32 %v423_v21, %v44_v20  ;;  %v135_v23 = vpop.f32.mrb[1].mxu0 }
  0xdd   :  { %v136_v24 = vadd.f32 %v135_v23, %v39_v18 }
  0xde   :  { %v159_v25 = vmul.f32 0.01, %v141_v22  ;;  %vm155_vm2 = vcmp.gt.f32.partialorder %v141_v22, 0.0 }
  0xdf   :  { %v158_v27 = vmul.f32 0.01, %v136_v24  ;;  %v426_v28 = vpop.f32.mrb[2].mxu0  ;;  %vm154_vm3 = vcmp.gt.f32.partialorder %v136_v24, 0.0 }
  0xe0   :  { %v151_v29 = vadd.f32 %v426_v28, %v54_v26  ;;  %v145_v30 = vpop.f32.mrb[3].mxu0  ;;  %v163_v31 = vsel %vm155_vm2, %v141_v22, %v159_v25 }
  0xe1   :  { %v146_v32 = vadd.f32 %v145_v30, %v49_v19  ;;  %v162_v33 = vsel %vm154_vm3, %v136_v24, %v158_v27 }
  0xe2   :  { %vm157_vm4 = vcmp.gt.f32.partialorder %v151_v29, 0.0  ;;  %v161_v34 = vmul.f32 0.01, %v151_v29  ;;  %v456_v35 = vpack.c.bf16 %v163_v31, %v162_v33 }
  0xe3   :  { %vm156_vm5 = vcmp.gt.f32.partialorder %v146_v32, 0.0  ;;  %v160_v36 = vmul.f32 0.01, %v146_v32 }
  0xe4   :  { %457 = vmatprep.subr.bf16.mxu1 %v456_v35  ;;  %v165_v37 = vsel %vm157_vm4, %v151_v29, %v161_v34 }
  0xe5   :  { %459 = vmatpush3.bf16.msra.mxu1 %v456_v35  ;;  %v164_v38 = vsel %vm156_vm5, %v146_v32, %v160_v36 }
  0xe6   :  { %v460_v39 = vpack.c.bf16 %v165_v37, %v164_v38 }
  0xe8   :  { %461 = vmatprep.subr.bf16.mxu1 %v460_v39 }
  0xe9   :  { %463 = vmatpush3.bf16.msra.mxu1 %v460_v39 }
  0xec   :  { %436 = vmatmul.mubr.msk.f32.vlgmr.msra.gmra.mrb[0].mxu1 %vm194_vm1, %v167_v40 }
  0xed   :  { %438 = vmatprep.mubr.msk.f32.mxu1 %vm194_vm1, %v168_v41 }
  0xf0   :  { %439 = vmatmul.mubr.msk.f32.gmra.mrb[2].mxu1 %vm194_vm1, %v169_v42 }
 0x1bf   :  { %v437_v47 = vpop.f32.mrb[0].mxu1 }
 0x1c0   :  { %v279_v48 = vadd.f32 %v437_v47, %v182_v45  ;;  %v273_v49 = vpop.f32.mrb[1].mxu1 }
 0x1c1   :  { %v274_v50 = vadd.f32 %v273_v49, %v177_v46 }
 0x1c2   :  { %vm293_vm7 = vcmp.gt.f32.partialorder %v279_v48, 0.0  ;;  %v297_v51 = vmul.f32 0.01, %v279_v48 }
 0x1c3   :  { %vm292_vm8 = vcmp.gt.f32.partialorder %v274_v50, 0.0  ;;  %v296_v53 = vmul.f32 0.01, %v274_v50  ;;  %v440_v54 = vpop.f32.mrb[2].mxu1 }
 0x1c4   :  { %v301_v56 = vsel %vm293_vm7, %v279_v48, %v297_v51  ;;  %v289_v57 = vadd.f32 %v440_v54, %v192_v52  ;;  %v283_v58 = vpop.f32.mrb[3].mxu1 }
 0x1c5   :  { %v300_v59 = vsel %vm292_vm8, %v274_v50, %v296_v53  ;;  %v284_v60 = vadd.f32 %v283_v58, %v187_v55 }
 0x1c6   :  { %v465_v61 = vpack.c.bf16 %v301_v56, %v300_v59  ;;  %vm295_vm9 = vcmp.gt.f32.partialorder %v289_v57, 0.0  ;;  %v299_v62 = vmul.f32 0.01, %v289_v57 }
 0x1c7   :  { %vm294_vm10 = vcmp.gt.f32.partialorder %v284_v60, 0.0  ;;  %v298_v63 = vmul.f32 0.01, %v284_v60 }
 0x1c8   :  { %v303_v0 = vsel %vm295_vm9, %v289_v57, %v299_v62  ;;  %466 = vmatpush3.bf16.msra.mxu0 %v465_v61 }
 0x1c9   :  { %v302_v1 = vsel %vm294_vm10, %v284_v60, %v298_v63  ;;  %467 = vmatprep.subr.bf16.mxu0 %v477_v43 }
 0x1ca   :  { %v468_v2 = vpack.c.bf16 %v303_v0, %v302_v1 }
 0x1cc   :  { %469 = vmatpush3.bf16.msra.mxu0 %v468_v2 }
 0x1cf   :  { %450 = vmatmul.mubr.msk.f32.vlgmr.msra.gmra.mrb[4].mxu0 %vm194_vm1, %v304_v3 }
 0x2a2   :  { %v380_v5 = vpop.f32.mrb[4].mxu0 }
 0x2a3   :  { %v381_v6 = vadd.f32 %v380_v5, %v309_v4  ;;  %v451_v7 = vpop.f32.mrb[5].mxu0 }
 0x2a5   :  { %384 = vst [vmem:[%s599_s7] sm:$0xff] %v381_v6 }

</bundles_post_ra>
